<compile_context>
chip_gen: v7x
topology: tpu7x:2x2x1
jax: 0.10.0
libtpu: 0.0.40
codegen_flags: <defaults>
</compile_context>

<pallas_src>
import functools

import jax
import jax.numpy as jnp
from jax import lax
from jax.experimental import pallas as pl
from jax.experimental.pallas import tpu as pltpu

# ---- configuration (consistent with the module) ------------------------------
B = 128          # batch for the demo (whole thing is <1 MB of VMEM)
W = 8            # window_size (seq length)
E = 32           # emb_size (features)
C = 128          # cond_embed_dim
NUM_GROUPS = 32  # nn.GroupNorm(32, cond_embed_dim)
GROUP_SIZE = C // NUM_GROUPS
EPS = 1e-5       # PyTorch GroupNorm default


def cond_avg_kernel(x_ref, w_ref, params_ref, pool_ref, o_ref):
    """Flatten -> Linear(bf16 weights, f32 acc) -> GroupNorm(32) -> SiLU."""
    x = x_ref[...].astype(jnp.bfloat16)              # [TB, W*E] bf16 operand
    w = w_ref[...]                                   # [W*E, C]  bf16 weights

    params = params_ref[...]                         # [8, C] f32 (padded)
    bias = params[0:1, :]
    gamma = params[1:2, :]
    beta = params[2:3, :]

    # Linear (MXU, bf16 inputs, f32 accumulation)
    y = jnp.dot(x, w, preferred_element_type=jnp.float32) + bias   # [TB, C] f32

    # GroupNorm statistics: one f32 pooling matmul for both mean and E[y^2].
    # P[c, c'] = 1/GROUP_SIZE if c, c' share a group else 0.
    tb = y.shape[0]
    stacked = jnp.concatenate([y, y * y], axis=0)                  # [2*TB, C]
    pooled = jnp.dot(stacked, pool_ref[...],
                     preferred_element_type=jnp.float32)           # [2*TB, C]
    mean = pooled[:tb, :]
    var = jnp.maximum(pooled[tb:, :] - mean * mean, 0.0)           # guard cancellation

    # Affine with gamma folded into the inverse std.
    scale = gamma * lax.rsqrt(var + EPS)
    z = (y - mean) * scale + beta

    # SiLU
    o_ref[...] = z * jax.nn.sigmoid(z)


@functools.partial(jax.jit, static_argnames=("tile_b",))
def cond_avg(cond, w_bf16, params, pool_mat, *, tile_b=None):
    """cond: [B, W, E] float32 -> [B, C] float32."""
    b, w, e = cond.shape
    in_features = w * e
    x2d = cond.reshape(b, in_features)               # row-major flatten == nn.Flatten(-2,-1)

    # Single grid step by default (overhead-bound problem; see header comment).
    if tile_b is None or tile_b >= b or (b % tile_b) != 0:
        tile_b = b
    steps = b // tile_b

    const = lambda i: (0, 0)                         # operands resident across grid steps
    grid_spec = pltpu.PrefetchScalarGridSpec(
        num_scalar_prefetch=0,
        grid=(steps,),
        in_specs=[
            pl.BlockSpec((tile_b, in_features), lambda i: (i, 0)),   # x tile
            pl.BlockSpec((in_features, C), const),                   # W^T (bf16)
            pl.BlockSpec((8, C), const),                             # [bias; gamma; beta; pad]
            pl.BlockSpec((C, C), const),                             # pooling matrix
        ],
        out_specs=pl.BlockSpec((tile_b, C), lambda i: (i, 0)),
    )
    # "parallel" only helps when there are actually multiple steps to shard.
    semantics = ("arbitrary",) if steps == 1 else ("parallel",)
    return pl.pallas_call(
        cond_avg_kernel,
        out_shape=jax.ShapeDtypeStruct((b, C), jnp.float32),
        grid_spec=grid_spec,
        compiler_params=pltpu.CompilerParams(dimension_semantics=semantics),
    )(x2d, w_bf16, params, pool_mat)


def make_params(key):
    """Deterministic synthetic parameters (shapes from the module __init__)."""
    k1, k2, k3, k4 = jax.random.split(key, 4)
    in_features = E * W
    # nn.Linear(emb_size * window_size, cond_embed_dim): weight [C, in], bias [C]
    w = jax.random.normal(k1, (C, in_features), jnp.float32) * (1.0 / jnp.sqrt(in_features))
    b = jax.random.normal(k2, (C,), jnp.float32) * 0.01
    # nn.GroupNorm(32, C): weight/bias [C] (perturbed away from identity so it matters)
    gamma = 1.0 + 0.1 * jax.random.normal(k3, (C,), jnp.float32)
    beta = 0.1 * jax.random.normal(k4, (C,), jnp.float32)

    w_bf16 = w.T.astype(jnp.bfloat16)                # [in, C] bf16 for x @ w

    # Merge bias/gamma/beta into one (8, C) f32 operand: one DMA instead of three.
    params = jnp.zeros((8, C), jnp.float32)
    params = params.at[0].set(b).at[1].set(gamma).at[2].set(beta)

    # Pooling matrix P = G @ G.T / GROUP_SIZE  (per-group averaging in one matmul)
    ch = jnp.arange(C)
    group_mat = (ch[:, None] // GROUP_SIZE == jnp.arange(NUM_GROUPS)[None, :]).astype(jnp.float32)
    pool_mat = (group_mat @ group_mat.T) * (1.0 / GROUP_SIZE)   # [C, C]
    return w_bf16, params, pool_mat


def cond_avg_reference(cond, w_bf16, params):
    """Pure-JAX reference (mirrors the PyTorch Sequential; same bf16 weights)."""
    b = cond.shape[0]
    x = cond.reshape(b, -1)
    bias, gamma, beta = params[0:1], params[1:2], params[2:3]
    y = jnp.dot(x.astype(jnp.bfloat16), w_bf16,
                preferred_element_type=jnp.float32) + bias
    yg = y.reshape(b, NUM_GROUPS, GROUP_SIZE)
    mean = yg.mean(axis=-1, keepdims=True)
    var = yg.var(axis=-1, keepdims=True)             # biased, like PyTorch GroupNorm
    yn = ((yg - mean) / jnp.sqrt(var + EPS)).reshape(b, C)
    z = yn * gamma + beta
    return z * jax.nn.sigmoid(z)


if __name__ == "__main__":
    key = jax.random.PRNGKey(0)
    k_in, k_par = jax.random.split(key)
    cond = jax.random.normal(k_in, (B, W, E), jnp.float32)   # [batch, seq=window, features]
    w_bf16, params, pool_mat = make_params(k_par)

    out = cond_avg(cond, w_bf16, params, pool_mat)           # single grid step
    out = jax.block_until_ready(out)

    ref = cond_avg_reference(cond, w_bf16, params)
    assert out.shape == (B, C)
    assert jnp.allclose(out, ref, atol=3e-3, rtol=3e-3), "mismatch vs reference"

    print("KERNEL_OK")
</pallas_src>

<mosaic_0001>
module attributes {stable_mosaic.version = 11 : i64} {
  func.func @cond_avg_kernel(%arg0: i32, %arg1: memref<128x256xf32, #tpu.memory_space<vmem>>, %arg2: memref<256x128xbf16, #tpu.memory_space<vmem>>, %arg3: memref<8x128xf32, #tpu.memory_space<vmem>>, %arg4: memref<128x128xf32, #tpu.memory_space<vmem>>, %arg5: memref<128x128xf32, #tpu.memory_space<vmem>>) attributes {dimension_semantics = [#tpu.dimension_semantics<arbitrary>], iteration_bounds = array<i64: 1>, scalar_prefetch = 0 : i64, scratch_operands = 0 : i64, tpu.core_type = #tpu.core_type<tc>, window_params = [{transform_indices = @transform_0, window_bounds = array<i64: 128, 256>}, {pipeline_mode = #tpu.pipeline_mode<synchronous>, transform_indices = @transform_1, window_bounds = array<i64: 256, 128>}, {pipeline_mode = #tpu.pipeline_mode<synchronous>, transform_indices = @transform_2, window_bounds = array<i64: 8, 128>}, {pipeline_mode = #tpu.pipeline_mode<synchronous>, transform_indices = @transform_3, window_bounds = array<i64: 128, 128>}, {transform_indices = @transform_4, window_bounds = array<i64: 128, 128>}]} {
    %c0 = arith.constant 0 : index
    %c0_0 = arith.constant 0 : index
    %0 = vector.load %arg1[%c0, %c0_0] : memref<128x256xf32, #tpu.memory_space<vmem>>, vector<128x256xf32>
    %1 = arith.truncf %0 : vector<128x256xf32> to vector<128x256xbf16>
    %c0_1 = arith.constant 0 : index
    %c0_2 = arith.constant 0 : index
    %2 = vector.load %arg2[%c0_1, %c0_2] : memref<256x128xbf16, #tpu.memory_space<vmem>>, vector<256x128xbf16>
    %c0_3 = arith.constant 0 : index
    %c0_4 = arith.constant 0 : index
    %3 = vector.load %arg3[%c0_3, %c0_4] : memref<8x128xf32, #tpu.memory_space<vmem>>, vector<8x128xf32>
    %4 = vector.extract_strided_slice %3 {offsets = [0, 0], sizes = [1, 128], strides = [1, 1]} : vector<8x128xf32> to vector<1x128xf32>
    %5 = vector.extract_strided_slice %3 {offsets = [1, 0], sizes = [1, 128], strides = [1, 1]} : vector<8x128xf32> to vector<1x128xf32>
    %6 = vector.extract_strided_slice %3 {offsets = [2, 0], sizes = [1, 128], strides = [1, 1]} : vector<8x128xf32> to vector<1x128xf32>
    %cst = arith.constant dense<0.000000e+00> : vector<128x128xf32>
    %7 = tpu.matmul %1, %2, %cst {dimension_numbers = #tpu.dot_dimension_numbers<[1], [0], [0], [1], [0, 0, 1, 1], [], []>} : vector<128x256xbf16>, vector<256x128xbf16>, vector<128x128xf32> -> vector<128x128xf32>
    %8 = vector.broadcast %4 : vector<1x128xf32> to vector<128x128xf32>
    %9 = arith.addf %7, %8 : vector<128x128xf32>
    %10 = arith.mulf %9, %9 : vector<128x128xf32>
    %11 = tpu.concatenate %9, %10 in 0 : vector<128x128xf32>, vector<128x128xf32> -> vector<256x128xf32>
    %c0_5 = arith.constant 0 : index
    %c0_6 = arith.constant 0 : index
    %12 = vector.load %arg4[%c0_5, %c0_6] : memref<128x128xf32, #tpu.memory_space<vmem>>, vector<128x128xf32>
    %cst_7 = arith.constant dense<0.000000e+00> : vector<256x128xf32>
    %13 = tpu.matmul %11, %12, %cst_7 {dimension_numbers = #tpu.dot_dimension_numbers<[1], [0], [0], [1], [0, 0, 1, 1], [], []>} : vector<256x128xf32>, vector<128x128xf32>, vector<256x128xf32> -> vector<256x128xf32>
    %14 = vector.extract_strided_slice %13 {offsets = [0, 0], sizes = [128, 128], strides = [1, 1]} : vector<256x128xf32> to vector<128x128xf32>
    %15 = vector.extract_strided_slice %13 {offsets = [128, 0], sizes = [128, 128], strides = [1, 1]} : vector<256x128xf32> to vector<128x128xf32>
    %16 = arith.mulf %14, %14 : vector<128x128xf32>
    %17 = arith.subf %15, %16 : vector<128x128xf32>
    %cst_8 = arith.constant 0.000000e+00 : f32
    %18 = vector.broadcast %cst_8 : f32 to vector<128x128xf32>
    %19 = arith.maximumf %17, %18 : vector<128x128xf32>
    %cst_9 = arith.constant 9.99999974E-6 : f32
    %20 = vector.broadcast %cst_9 : f32 to vector<128x128xf32>
    %21 = arith.addf %19, %20 : vector<128x128xf32>
    %22 = math.rsqrt %21 : vector<128x128xf32>
    %23 = vector.broadcast %5 : vector<1x128xf32> to vector<128x128xf32>
    %24 = arith.mulf %23, %22 : vector<128x128xf32>
    %25 = arith.subf %9, %14 : vector<128x128xf32>
    %26 = arith.mulf %25, %24 : vector<128x128xf32>
    %27 = vector.broadcast %6 : vector<1x128xf32> to vector<128x128xf32>
    %28 = arith.addf %26, %27 : vector<128x128xf32>
    %29 = arith.negf %28 : vector<128x128xf32>
    %30 = math.exp %29 : vector<128x128xf32>
    %cst_10 = arith.constant 1.000000e+00 : f32
    %31 = vector.broadcast %cst_10 : f32 to vector<128x128xf32>
    %32 = arith.addf %31, %30 : vector<128x128xf32>
    %33 = arith.divf %31, %32 : vector<128x128xf32>
    %34 = arith.mulf %28, %33 : vector<128x128xf32>
    %c0_11 = arith.constant 0 : index
    %c0_12 = arith.constant 0 : index
    %35 = vector.load %arg5[%c0_11, %c0_12] : memref<128x128xf32, #tpu.memory_space<vmem>>, vector<128x128xf32>
    tpu.vector_store %arg5[%c0_11, %c0_12], %34 {strides = array<i32>} : memref<128x128xf32, #tpu.memory_space<vmem>>, vector<128x128xf32>,
    return
  }
  func.func @transform_0(%arg0: i32) -> (i32, i32) {
    %c0_i32 = arith.constant 0 : i32
    %c0_i32_0 = arith.constant 0 : i32
    return %arg0, %c0_i32 : i32, i32
  }
  func.func @transform_1(%arg0: i32) -> (i32, i32) {
    %c0_i32 = arith.constant 0 : i32
    %c0_i32_0 = arith.constant 0 : i32
    %c0_i32_1 = arith.constant 0 : i32
    return %c0_i32, %c0_i32_0 : i32, i32
  }
  func.func @transform_2(%arg0: i32) -> (i32, i32) {
    %c0_i32 = arith.constant 0 : i32
    %c0_i32_0 = arith.constant 0 : i32
    %c0_i32_1 = arith.constant 0 : i32
    return %c0_i32, %c0_i32_0 : i32, i32
  }
  func.func @transform_3(%arg0: i32) -> (i32, i32) {
    %c0_i32 = arith.constant 0 : i32
    %c0_i32_0 = arith.constant 0 : i32
    %c0_i32_1 = arith.constant 0 : i32
    return %c0_i32, %c0_i32_0 : i32, i32
  }
  func.func @transform_4(%arg0: i32) -> (i32, i32) {
    %c0_i32 = arith.constant 0 : i32
    %c0_i32_0 = arith.constant 0 : i32
    return %arg0, %c0_i32 : i32, i32
  }
}

</mosaic_0001>

<bundles_post_ra>
// kernel: cond_avg.1
= control target key start
LH: loop header
LB: loop body
LE: loop exit
PB: predicated region body
PF: predicated region fallthrough
CT: control target
= control target key end

     0   :  { %s1791_s0 = inlined_call_operand.vmem [shape: f32[128,256], index: 0, kind: input, shape index: {}]   ;;  %s1792_s1 = inlined_call_operand.vmem [shape: bf16[256,128], index: 1, kind: input, shape index: {}]   ;;  %s1793_s2 = inlined_call_operand.vmem [shape: f32[8,128], index: 2, kind: input, shape index: {}]   ;;  %s1794_s3 = inlined_call_operand.vmem [shape: f32[128,128], index: 3, kind: input, shape index: {}]   ;;  %s1795_s4 = inlined_call_operand.hbm [shape: f32[128,128], index: 4, kind: output, shape index: {}]  }
   0x1   :  { %v1109_v0 = vld [vmem:[%s1792_s1 + $0x40] sm:$0xff]   ;;  %v1111_v2 = vld [vmem:[%s1792_s1 + $0x48] sm:$0xff]   ;;  %v1113_v4 = vld [vmem:[%s1792_s1 + $0x50] sm:$0xff]  }
   0x2   :  { %v1110_v1 = vld [vmem:[%s1792_s1] sm:$0xff]   ;;  %882 = vmatprep.subr.bf16.mxu0 %v1109_v0  ;;  %v1112_v3 = vld [vmem:[%s1792_s1 + $0x8] sm:$0xff]   ;;  %v1114_v5 = vld [vmem:[%s1792_s1 + $0x10] sm:$0xff]  }
   0x3   :  { %883 = vmatpush3.bf16.msra.mxu0 %v1110_v1  ;;  %v1115_v6 = vld [vmem:[%s1792_s1 + $0x58] sm:$0xff]   ;;  %v1117_v8 = vld [vmem:[%s1792_s1 + $0x60] sm:$0xff]   ;;  %v1119_v10 = vld [vmem:[%s1792_s1 + $0x68] sm:$0xff]  }
   0x4   :  { %884 = vmatprep.subr.bf16.mxu0 %v1111_v2  ;;  %v1116_v7 = vld [vmem:[%s1792_s1 + $0x18] sm:$0xff]   ;;  %v1118_v9 = vld [vmem:[%s1792_s1 + $0x20] sm:$0xff]   ;;  %v20_v11 = vld [vmem:[%s1791_s0 + $0x8] sm:$0xff] }
   0x5   :  { %v22_v12 = vld [vmem:[%s1791_s0 + $0x18] sm:$0xff]  ;;  %v1120_v14 = vld [vmem:[%s1792_s1 + $0x28] sm:$0xff]   ;;  %v1121_v15 = vld [vmem:[%s1792_s1 + $0x70] sm:$0xff]  }
   0x6   :  { %v52_v13 = vpack.c.bf16 %v22_v12, %v20_v11  ;;  %v1122_v16 = vld [vmem:[%s1792_s1 + $0x30] sm:$0xff]   ;;  %v1123_v17 = vld [vmem:[%s1792_s1 + $0x78] sm:$0xff]   ;;  %v19_v19 = vld [vmem:[%s1791_s0] sm:$0xff] }
   0x7   :  { %885 = vmatpush3.bf16.msra.mxu0 %v1112_v3  ;;  %v1124_v18 = vld [vmem:[%s1792_s1 + $0x38] sm:$0xff]   ;;  %v21_v20 = vld [vmem:[%s1791_s0 + $0x10] sm:$0xff]  ;;  %v313_v21 = vld [vmem:[%s1794_s3] sm:$0xff] }
   0x8   :  { %886 = vmatprep.subr.bf16.mxu0 %v1113_v4  ;;  %232 = vmatprep.mubr.bf16.mxu0 %v52_v13  ;;  %v314_v22 = vld [vmem:[%s1794_s3 + $0x8] sm:$0xff]  ;;  %v315_v23 = vld [vmem:[%s1794_s3 + $0x10] sm:$0xff]  ;;  %v316_v24 = vld [vmem:[%s1794_s3 + $0x18] sm:$0xff]  ;;  %v51_v31 = vpack.c.bf16 %v21_v20, %v19_v19 }
   0x9   :  { %v24_v25 = vld [vmem:[%s1791_s0 + $0x28] sm:$0xff]  ;;  %v26_v26 = vld [vmem:[%s1791_s0 + $0x38] sm:$0xff]  ;;  %v1074_v27 = vpack.c.bf16 %v314_v22, %v313_v21  ;;  %v1078_v28 = vpack.c.bf16 %v316_v24, %v315_v23  ;;  %v317_v29 = vld [vmem:[%s1794_s3 + $0x20] sm:$0xff] }
   0xa   :  { %v318_v30 = vld [vmem:[%s1794_s3 + $0x28] sm:$0xff] }
   0xb   :  { %887 = vmatpush3.bf16.msra.mxu0 %v1114_v5  ;;  %1075 = vmatprep.subr.bf16.mxu1 %v1074_v27 }
   0xc   :  { %888 = vmatprep.subr.bf16.mxu0 %v1115_v6 }
   0xf   :  { %889 = vmatpush3.bf16.msra.mxu0 %v1116_v7 }
  0x10   :  { %890 = vmatprep.subr.bf16.mxu0 %v1117_v8 }
  0x13   :  { %891 = vmatpush3.bf16.msra.mxu0 %v1118_v9 }
  0x14   :  { %892 = vmatprep.subr.bf16.mxu0 %v1119_v10 }
  0x17   :  { %893 = vmatpush3.bf16.msra.mxu0 %v1120_v14 }
  0x18   :  { %894 = vmatprep.subr.bf16.mxu0 %v1121_v15 }
  0x1b   :  { %895 = vmatpush3.bf16.msra.mxu0 %v1122_v16 }
  0x1c   :  { %896 = vmatprep.subr.bf16.mxu0 %v1123_v17 }
  0x1d   :  { %9 = vsyncpa [#allocation3], 0  ;;  %v54_v32 = vpack.c.bf16 %v26_v26, %v24_v25  ;;  %1077 = vmatpush3.bf16.msra.mxu1 %v1074_v27  ;;  %v1082_v33 = vpack.c.bf16 %v318_v30, %v317_v29  ;;  %v319_v34 = vld [vmem:[%s1794_s3 + $0x30] sm:$0xff]  ;;  %v320_v35 = vld [vmem:[%s1794_s3 + $0x38] sm:$0xff]  ;;  %v100_v21 = vlaneseq }
  0x1e   :  { %1079 = vmatprep.subr.bf16.mxu1 %v1078_v28  ;;  %v23_v36 = vld [vmem:[%s1791_s0 + $0x20] sm:$0xff]  ;;  %v25_v37 = vld [vmem:[%s1791_s0 + $0x30] sm:$0xff]  ;;  %v28_v38 = vld [vmem:[%s1791_s0 + $0x48] sm:$0xff]  ;;  %v1086_v40 = vpack.c.bf16 %v320_v35, %v319_v34 }
  0x1f   :  { %897 = vmatpush3.bf16.msra.mxu0 %v1124_v18  ;;  %v30_v39 = vld [vmem:[%s1791_s0 + $0x58] sm:$0xff]  ;;  %v321_v41 = vld [vmem:[%s1794_s3 + $0x40] sm:$0xff]  ;;  %v322_v42 = vld [vmem:[%s1794_s3 + $0x48] sm:$0xff]  ;;  %v53_v43 = vpack.c.bf16 %v25_v37, %v23_v36  ;;  %v101_v24 = vshrl.u32 %v100_v21, 7 }
  0x20   :  { %v56_v44 = vpack.c.bf16 %v30_v39, %v28_v38  ;;  %v1090_v45 = vpack.c.bf16 %v322_v42, %v321_v41  ;;  %v323_v46 = vld [vmem:[%s1794_s3 + $0x50] sm:$0xff]  ;;  %v324_v47 = vld [vmem:[%s1794_s3 + $0x58] sm:$0xff]  ;;  %v27_v48 = vld [vmem:[%s1791_s0 + $0x40] sm:$0xff] }
  0x21   :  { %1081 = vmatpush3.bf16.msra.mxu1 %v1078_v28  ;;  %v29_v49 = vld [vmem:[%s1791_s0 + $0x50] sm:$0xff]  ;;  %v32_v50 = vld [vmem:[%s1791_s0 + $0x68] sm:$0xff]  ;;  %v34_v51 = vld [vmem:[%s1791_s0 + $0x78] sm:$0xff]  ;;  %v1094_v52 = vpack.c.bf16 %v324_v47, %v323_v46  ;;  %v636_v26 = vsub.s32 1, %v101_v24  ;;  %v688_v27 = vsub.s32 2, %v101_v24 }
  0x22   :  { %233 = vmatmul.mubr.bf16.vlgmr.msra.gmra.mrb[0].mxu0 %v51_v31  ;;  %1083 = vmatprep.subr.bf16.mxu1 %v1082_v33  ;;  %v55_v53 = vpack.c.bf16 %v29_v49, %v27_v48  ;;  %v58_v54 = vpack.c.bf16 %v34_v51, %v32_v50  ;;  %v31_v55 = vld [vmem:[%s1791_s0 + $0x60] sm:$0xff]  ;;  %v33_v56 = vld [vmem:[%s1791_s0 + $0x70] sm:$0xff]  ;;  %v36_v57 = vld [vmem:[%s1791_s0 + $0x88] sm:$0xff]  ;;  %v102_v31 = vsub.s32 0, %v101_v24 }
  0x23   :  { %240 = vmatprep.mubr.bf16.mxu0 %v54_v32  ;;  %v38_v58 = vld [vmem:[%s1791_s0 + $0x98] sm:$0xff]  ;;  %v57_v59 = vpack.c.bf16 %v33_v56, %v31_v55  ;;  %v35_v61 = vld [vmem:[%s1791_s0 + $0x80] sm:$0xff]  ;;  %v37_v62 = vld [vmem:[%s1791_s0 + $0x90] sm:$0xff] }
  0x24   :  { %v60_v60 = vpack.c.bf16 %v38_v58, %v36_v57  ;;  %v40_v63 = vld [vmem:[%s1791_s0 + $0xa8] sm:$0xff]  ;;  %v42_v0 = vld [vmem:[%s1791_s0 + $0xb8] sm:$0xff]  ;;  %v59_v1 = vpack.c.bf16 %v37_v62, %v35_v61  ;;  %v39_v3 = vld [vmem:[%s1791_s0 + $0xa0] sm:$0xff] }
  0x25   :  { %1085 = vmatpush3.bf16.msra.mxu1 %v1082_v33  ;;  %v62_v2 = vpack.c.bf16 %v42_v0, %v40_v63  ;;  %v41_v4 = vld [vmem:[%s1791_s0 + $0xb0] sm:$0xff]  ;;  %v44_v5 = vld [vmem:[%s1791_s0 + $0xc8] sm:$0xff]  ;;  %v46_v6 = vld [vmem:[%s1791_s0 + $0xd8] sm:$0xff] }
  0x26   :  { %1087 = vmatprep.subr.bf16.mxu1 %v1086_v40  ;;  %v61_v7 = vpack.c.bf16 %v41_v4, %v39_v3  ;;  %v64_v8 = vpack.c.bf16 %v46_v6, %v44_v5  ;;  %v43_v9 = vld [vmem:[%s1791_s0 + $0xc0] sm:$0xff]  ;;  %v45_v10 = vld [vmem:[%s1791_s0 + $0xd0] sm:$0xff]  ;;  %v48_v11 = vld [vmem:[%s1791_s0 + $0xe8] sm:$0xff] }
  0x27   :  { %v50_v12 = vld [vmem:[%s1791_s0 + $0xf8] sm:$0xff]  ;;  %v63_v13 = vpack.c.bf16 %v45_v10, %v43_v9  ;;  %v47_v15 = vld [vmem:[%s1791_s0 + $0xe0] sm:$0xff]  ;;  %v49_v16 = vld [vmem:[%s1791_s0 + $0xf0] sm:$0xff] }
  0x28   :  { %v66_v14 = vpack.c.bf16 %v50_v12, %v48_v11  ;;  %v65_v17 = vpack.c.bf16 %v49_v16, %v47_v15  ;;  %v325_v18 = vld [vmem:[%s1794_s3 + $0x60] sm:$0xff]  ;;  %v326_v19 = vld [vmem:[%s1794_s3 + $0x68] sm:$0xff]  ;;  %v327_v22 = vld [vmem:[%s1794_s3 + $0x70] sm:$0xff] }
  0x29   :  { %1089 = vmatpush3.bf16.msra.mxu1 %v1086_v40  ;;  %v1098_v20 = vpack.c.bf16 %v326_v19, %v325_v18  ;;  %v328_v23 = vld [vmem:[%s1794_s3 + $0x78] sm:$0xff]  ;;  %v99_v28 = vld [vmem:[%s1793_s2] sm:$0xff]  ;;  %s1245_s2 = smov [#allocation2]  }
  0x2a   :  { %241 = vmatmul.mubr.bf16.gmra.mrb[4].mxu0 %v53_v43  ;;  %1091 = vmatprep.subr.bf16.mxu1 %v1090_v45  ;;  %v1102_v25 = vpack.c.bf16 %v328_v23, %v327_v22  ;;  %v1468_v29 = vrot.slane %v99_v28, %v636_v26  ;;  %v1470_v30 = vrot.slane %v99_v28, %v688_v27  ;;  %s839_s3 = sshll.u32 %s1245_s2, 4  ;;  %s840_s3 = int_to_ptr.vmem [resolvable:$true] %s839_s3 }
  0x2b   :  { %248 = vmatprep.mubr.bf16.mxu0 %v56_v44  ;;  %v1472_v33 = vrot.slane %v99_v28, %v102_v31  ;;  %s1221_s10 = scalar_lea.vmem %s840_s3, 2048  ;;  %p1226_p1 = scmp.lt.s32.totalorder %s840_s3, %s840_s3 }
  0x2c   :  { %p1222_p0 = scmp.ne.s32.totalorder %s840_s3, %s1221_s10  ;;  %p1227_p2 = scmp.lt.s32.totalorder %s1221_s10, %s1221_s10 }
  0x2d   :  { %1093 = vmatpush3.bf16.msra.mxu1 %v1090_v45 }
  0x2e   :  { %1095 = vmatprep.subr.bf16.mxu1 %v1094_v52  ;;  %p1228_p3 = por %p1227_p2, %p1226_p1 }
  0x30   :  { %p1229_p4 = pnand %p1228_p3, %p1222_p0 }
  0x31   :  { %1097 = vmatpush3.bf16.msra.mxu1 %v1094_v52 }
  0x32   :  { %249 = vmatmul.mubr.bf16.gmra.mrb[8].mxu0 %v55_v53  ;;  %1099 = vmatprep.subr.bf16.mxu1 %v1098_v20 }
  0x33   :  { %256 = vmatprep.mubr.bf16.mxu0 %v58_v54 }
  0x35   :  { %1101 = vmatpush3.bf16.msra.mxu1 %v1098_v20 }
  0x36   :  { %1103 = vmatprep.subr.bf16.mxu1 %v1102_v25 }
  0x39   :  { %1105 = vmatpush3.bf16.msra.mxu1 %v1102_v25 }
  0x3a   :  { %257 = vmatmul.mubr.bf16.gmra.mrb[12].mxu0 %v57_v59 }
  0x3b   :  { %264 = vmatprep.mubr.bf16.mxu0 %v60_v60 }
  0x42   :  { %265 = vmatmul.mubr.bf16.gmra.mrb[16].mxu0 %v59_v1 }
  0x43   :  { %272 = vmatprep.mubr.bf16.mxu0 %v62_v2 }
  0x4a   :  { %273 = vmatmul.mubr.bf16.gmra.mrb[20].mxu0 %v61_v7 }
  0x4b   :  { %280 = vmatprep.mubr.bf16.mxu0 %v64_v8 }
  0x52   :  { %281 = vmatmul.mubr.bf16.gmra.mrb[24].mxu0 %v63_v13 }
  0x53   :  { %288 = vmatprep.mubr.bf16.mxu0 %v66_v14 }
  0x5a   :  { %289 = vmatmul.mubr.bf16.gmra.mrb[28].mxu0 %v65_v17 }
  0xf5   :  { %v898_v32 = vpop.f32.mrb[0].mxu0 }
  0xf6   :  { %v899_v34 = vpop.f32.mrb[1].mxu0 }
  0xf7   :  { %v900_v35 = vadd.f32 %v899_v34, %v898_v32  ;;  %v901_v36 = vpop.f32.mrb[2].mxu0 }
  0xf8   :  { %v902_v37 = vpop.f32.mrb[3].mxu0 }
  0xf9   :  { %v1475_v38 = vadd.f32 %v900_v35, %v1472_v33  ;;  %v903_v39 = vadd.f32 %v902_v37, %v901_v36 }
  0xfb   :  { %v1478_v40 = vadd.f32 %v903_v39, %v1472_v33  ;;  %1026 = vmatprep.mubr.f32.mxu1 %v1475_v38  ;;  %v297_v36 = vmul.f32 %v1475_v38, %v1475_v38 }
  0xfd   :  { %v904_v41 = vpop.f32.mrb[4].mxu0  ;;  %1027 = vmatmul.mubr.f32.vlgmr.msra.gmra.mrb[0].mxu1 %v1478_v40  ;;  %v298_v37 = vmul.f32 %v1478_v40, %v1478_v40 }
  0xfe   :  { %v905_v42 = vpop.f32.mrb[5].mxu0 }
  0xff   :  { %v906_v43 = vadd.f32 %v905_v42, %v904_v41  ;;  %v907_v44 = vpop.f32.mrb[6].mxu0 }
 0x100   :  { %v908_v45 = vpop.f32.mrb[7].mxu0 }
 0x101   :  { %v1483_v46 = vadd.f32 %v906_v43, %v1472_v33  ;;  %v909_v47 = vadd.f32 %v908_v45, %v907_v44 }
 0x103   :  { %v1486_v48 = vadd.f32 %v909_v47, %v1472_v33  ;;  %1029 = vmatprep.mubr.f32.mxu1 %v1483_v46  ;;  %v299_v39 = vmul.f32 %v1483_v46, %v1483_v46 }
 0x105   :  { %v910_v49 = vpop.f32.mrb[8].mxu0  ;;  %1030 = vmatmul.mubr.f32.gmra.mrb[2].mxu1 %v1486_v48 }
 0x106   :  { %v911_v50 = vpop.f32.mrb[9].mxu0 }
 0x107   :  { %v912_v51 = vadd.f32 %v911_v50, %v910_v49  ;;  %v913_v52 = vpop.f32.mrb[10].mxu0 }
 0x108   :  { %v914_v53 = vpop.f32.mrb[11].mxu0 }
 0x109   :  { %v1491_v54 = vadd.f32 %v912_v51, %v1472_v33  ;;  %v915_v55 = vadd.f32 %v914_v53, %v913_v52 }
 0x10b   :  { %v1494_v56 = vadd.f32 %v915_v55, %v1472_v33  ;;  %1032 = vmatprep.mubr.f32.mxu1 %v1491_v54  ;;  %v301_v41 = vmul.f32 %v1491_v54, %v1491_v54 }
 0x10d   :  { %v916_v57 = vpop.f32.mrb[12].mxu0  ;;  %1033 = vmatmul.mubr.f32.gmra.mrb[4].mxu1 %v1494_v56  ;;  %v302_v42 = vmul.f32 %v1494_v56, %v1494_v56 }
 0x10e   :  { %v917_v58 = vpop.f32.mrb[13].mxu0 }
 0x10f   :  { %v918_v59 = vadd.f32 %v917_v58, %v916_v57  ;;  %v919_v60 = vpop.f32.mrb[14].mxu0 }
 0x110   :  { %v920_v61 = vpop.f32.mrb[15].mxu0 }
 0x111   :  { %v1499_v62 = vadd.f32 %v918_v59, %v1472_v33  ;;  %v921_v63 = vadd.f32 %v920_v61, %v919_v60 }
 0x113   :  { %v1502_v0 = vadd.f32 %v921_v63, %v1472_v33  ;;  %1035 = vmatprep.mubr.f32.mxu1 %v1499_v62  ;;  %v303_v43 = vmul.f32 %v1499_v62, %v1499_v62 }
 0x115   :  { %v922_v1 = vpop.f32.mrb[16].mxu0  ;;  %1036 = vmatmul.mubr.f32.gmra.mrb[6].mxu1 %v1502_v0  ;;  %v304_v44 = vmul.f32 %v1502_v0, %v1502_v0 }
 0x116   :  { %v923_v2 = vpop.f32.mrb[17].mxu0 }
 0x117   :  { %v924_v3 = vadd.f32 %v923_v2, %v922_v1  ;;  %v925_v4 = vpop.f32.mrb[18].mxu0 }
 0x118   :  { %v926_v5 = vpop.f32.mrb[19].mxu0 }
 0x119   :  { %v1507_v6 = vadd.f32 %v924_v3, %v1472_v33  ;;  %v927_v7 = vadd.f32 %v926_v5, %v925_v4 }
 0x11b   :  { %v1510_v8 = vadd.f32 %v927_v7, %v1472_v33  ;;  %1038 = vmatprep.mubr.f32.mxu1 %v1507_v6  ;;  %v305_v45 = vmul.f32 %v1507_v6, %v1507_v6 }
 0x11d   :  { %v928_v9 = vpop.f32.mrb[20].mxu0  ;;  %1039 = vmatmul.mubr.f32.gmra.mrb[8].mxu1 %v1510_v8  ;;  %v306_v47 = vmul.f32 %v1510_v8, %v1510_v8 }
 0x11e   :  { %v929_v10 = vpop.f32.mrb[21].mxu0 }
 0x11f   :  { %v930_v11 = vadd.f32 %v929_v10, %v928_v9  ;;  %v931_v12 = vpop.f32.mrb[22].mxu0 }
 0x120   :  { %v932_v13 = vpop.f32.mrb[23].mxu0 }
 0x121   :  { %v1515_v14 = vadd.f32 %v930_v11, %v1472_v33  ;;  %v933_v15 = vadd.f32 %v932_v13, %v931_v12 }
 0x123   :  { %v1518_v16 = vadd.f32 %v933_v15, %v1472_v33  ;;  %1041 = vmatprep.mubr.f32.mxu1 %v1515_v14  ;;  %v307_v49 = vmul.f32 %v1515_v14, %v1515_v14 }
 0x125   :  { %v934_v17 = vpop.f32.mrb[24].mxu0  ;;  %1042 = vmatmul.mubr.f32.gmra.mrb[10].mxu1 %v1518_v16  ;;  %v308_v50 = vmul.f32 %v1518_v16, %v1518_v16 }
 0x126   :  { %v935_v18 = vpop.f32.mrb[25].mxu0 }
 0x127   :  { %v936_v19 = vadd.f32 %v935_v18, %v934_v17  ;;  %v937_v20 = vpop.f32.mrb[26].mxu0 }
 0x128   :  { %v938_v21 = vpop.f32.mrb[27].mxu0 }
 0x129   :  { %v1523_v22 = vadd.f32 %v936_v19, %v1472_v33  ;;  %v939_v23 = vadd.f32 %v938_v21, %v937_v20 }
 0x12b   :  { %v1526_v24 = vadd.f32 %v939_v23, %v1472_v33  ;;  %1044 = vmatprep.mubr.f32.mxu1 %v1523_v22  ;;  %v309_v51 = vmul.f32 %v1523_v22, %v1523_v22 }
 0x12d   :  { %v940_v25 = vpop.f32.mrb[28].mxu0  ;;  %1045 = vmatmul.mubr.f32.gmra.mrb[12].mxu1 %v1526_v24  ;;  %v310_v52 = vmul.f32 %v1526_v24, %v1526_v24 }
 0x12e   :  { %v941_v26 = vpop.f32.mrb[29].mxu0 }
 0x12f   :  { %v942_v27 = vadd.f32 %v941_v26, %v940_v25  ;;  %v943_v28 = vpop.f32.mrb[30].mxu0 }
 0x130   :  { %v944_v31 = vpop.f32.mrb[31].mxu0 }
 0x131   :  { %v1531_v32 = vadd.f32 %v942_v27, %v1472_v33  ;;  %v945_v34 = vadd.f32 %v944_v31, %v943_v28 }
 0x133   :  { %v1534_v35 = vadd.f32 %v945_v34, %v1472_v33  ;;  %1047 = vmatprep.mubr.f32.mxu1 %v1531_v32  ;;  %v300_v33 = vmul.f32 %v1486_v48, %v1486_v48  ;;  %v311_v53 = vmul.f32 %v1531_v32, %v1531_v32 }
 0x135   :  { %1048 = vmatmul.mubr.f32.gmra.mrb[14].mxu1 %v1534_v35  ;;  %v312_v55 = vmul.f32 %v1534_v35, %v1534_v35 }
 0x136   :  { %1050 = vmatprep.mubr.f32.mxu1 %v297_v36 }
 0x139   :  { %1051 = vmatmul.mubr.f32.gmra.mrb[16].mxu1 %v298_v37 }
 0x13a   :  { %1053 = vmatprep.mubr.f32.mxu1 %v299_v39 }
 0x13d   :  { %1054 = vmatmul.mubr.f32.gmra.mrb[18].mxu1 %v300_v33 }
 0x13e   :  { %1056 = vmatprep.mubr.f32.mxu1 %v301_v41 }
 0x141   :  { %1057 = vmatmul.mubr.f32.gmra.mrb[20].mxu1 %v302_v42 }
 0x142   :  { %1059 = vmatprep.mubr.f32.mxu1 %v303_v43 }
 0x145   :  { %1060 = vmatmul.mubr.f32.gmra.mrb[22].mxu1 %v304_v44 }
 0x146   :  { %1062 = vmatprep.mubr.f32.mxu1 %v305_v45 }
 0x149   :  { %1063 = vmatmul.mubr.f32.gmra.mrb[24].mxu1 %v306_v47 }
 0x14a   :  { %1065 = vmatprep.mubr.f32.mxu1 %v307_v49 }
 0x14d   :  { %1066 = vmatmul.mubr.f32.gmra.mrb[26].mxu1 %v308_v50 }
 0x14e   :  { %1068 = vmatprep.mubr.f32.mxu1 %v309_v51 }
 0x151   :  { %1069 = vmatmul.mubr.f32.gmra.mrb[28].mxu1 %v310_v52 }
 0x152   :  { %1071 = vmatprep.mubr.f32.mxu1 %v311_v53 }
 0x155   :  { %1072 = vmatmul.mubr.f32.gmra.mrb[30].mxu1 %v312_v55 }
 0x1d0   :  { %v1570_v57 = vpop.f32.mrb[0].mxu1 }
 0x1d1   :  { %v1572_v58 = vpop.f32.mrb[1].mxu1  ;;  %v555_v13 = vmul.f32 %v1570_v57, %v1570_v57  ;;  %v655_v49 = vsub.f32 %v1478_v40, %v1570_v57 }
 0x1d2   :  { %v554_v15 = vmul.f32 %v1572_v58, %v1572_v58  ;;  %v654_v52 = vsub.f32 %v1475_v38, %v1572_v58 }
 0x1d8   :  { %v1574_v59 = vpop.f32.mrb[2].mxu1 }
 0x1d9   :  { %v1576_v60 = vpop.f32.mrb[3].mxu1  ;;  %v557_v21 = vmul.f32 %v1574_v59, %v1574_v59 }
 0x1da   :  { %v556_v25 = vmul.f32 %v1576_v60, %v1576_v60  ;;  %v656_v40 = vsub.f32 %v1483_v46, %v1576_v60 }
 0x1e0   :  { %v1578_v61 = vpop.f32.mrb[4].mxu1 }
 0x1e1   :  { %v1580_v63 = vpop.f32.mrb[5].mxu1  ;;  %v559_v39 = vmul.f32 %v1578_v61, %v1578_v61  ;;  %v659_v38 = vsub.f32 %v1494_v56, %v1578_v61 }
 0x1e2   :  { %v558_v41 = vmul.f32 %v1580_v63, %v1580_v63 }
 0x1e8   :  { %v1582_v1 = vpop.f32.mrb[6].mxu1 }
 0x1e9   :  { %v1584_v2 = vpop.f32.mrb[7].mxu1  ;;  %v561_v53 = vmul.f32 %v1582_v1, %v1582_v1 }
 0x1f0   :  { %v1586_v3 = vpop.f32.mrb[8].mxu1 }
 0x1f1   :  { %v1588_v4 = vpop.f32.mrb[9].mxu1  ;;  %v563_v46 = vmul.f32 %v1586_v3, %v1586_v3 }
 0x1f8   :  { %v1590_v5 = vpop.f32.mrb[10].mxu1 }
 0x1f9   :  { %v1592_v7 = vpop.f32.mrb[11].mxu1 }
 0x200   :  { %v1594_v9 = vpop.f32.mrb[12].mxu1 }
 0x201   :  { %v1596_v10 = vpop.f32.mrb[13].mxu1 }
 0x208   :  { %v1598_v11 = vpop.f32.mrb[14].mxu1 }
 0x209   :  { %v1600_v12 = vpop.f32.mrb[15].mxu1 }
 0x20c   :  { %v1052_v17 = vpop.f32.mrb[16].mxu1 }
 0x20d   :  { %v571_v18 = vsub.f32 %v1052_v17, %v555_v13  ;;  %v475_v19 = vpop.f32.mrb[17].mxu1  ;;  %v657_v13 = vsub.f32 %v1486_v48, %v1574_v59  ;;  %v661_v48 = vsub.f32 %v1502_v0, %v1582_v1 }
 0x20e   :  { %v570_v20 = vsub.f32 %v475_v19, %v554_v15  ;;  %v560_v15 = vmul.f32 %v1584_v2, %v1584_v2 }
 0x20f   :  { %v587_v23 = vmax.f32 %v571_v18, 0.0 }
 0x210   :  { %v586_v26 = vmax.f32 %v570_v20, 0.0  ;;  %v1055_v27 = vpop.f32.mrb[18].mxu1  ;;  %v658_v20 = vsub.f32 %v1491_v54, %v1580_v63 }
 0x211   :  { %v603_v28 = vadd.f32 1e-05, %v587_v23  ;;  %v573_v31 = vsub.f32 %v1055_v27, %v557_v21  ;;  %v485_v34 = vpop.f32.mrb[19].mxu1  ;;  %v660_v23 = vsub.f32 %v1499_v62, %v1584_v2 }
 0x212   :  { %v602_v36 = vadd.f32 1e-05, %v586_v26  ;;  %v572_v37 = vsub.f32 %v485_v34, %v556_v25  ;;  %v663_v25 = vsub.f32 %v1510_v8, %v1586_v3  ;;  %v562_v26 = vmul.f32 %v1588_v4, %v1588_v4 }
 0x213   :  { %1125 = vrsqrt.f32 %v603_v28  ;;  %v589_v33 = vmax.f32 %v573_v31, 0.0  ;;  %v565_v34 = vmul.f32 %v1590_v5, %v1590_v5 }
 0x214   :  { %1127 = vrsqrt.f32 %v602_v36  ;;  %v588_v42 = vmax.f32 %v572_v37, 0.0  ;;  %v1058_v43 = vpop.f32.mrb[20].mxu1  ;;  %v564_v36 = vmul.f32 %v1592_v7, %v1592_v7 }
 0x215   :  { %v605_v44 = vadd.f32 1e-05, %v589_v33  ;;  %v575_v45 = vsub.f32 %v1058_v43, %v559_v39  ;;  %v495_v47 = vpop.f32.mrb[21].mxu1 }
 0x216   :  { %v604_v50 = vadd.f32 1e-05, %v588_v42  ;;  %v574_v51 = vsub.f32 %v495_v47, %v558_v41  ;;  %v567_v42 = vmul.f32 %v1594_v9, %v1594_v9  ;;  %v566_v47 = vmul.f32 %v1596_v10, %v1596_v10 }
 0x217   :  { %1129 = vrsqrt.f32 %v605_v44  ;;  %v591_v55 = vmax.f32 %v575_v45, 0.0 }
 0x218   :  { %1131 = vrsqrt.f32 %v604_v50  ;;  %v590_v17 = vmax.f32 %v574_v51, 0.0  ;;  %v1061_v18 = vpop.f32.mrb[22].mxu1 }
 0x219   :  { %v607_v57 = vadd.f32 1e-05, %v591_v55  ;;  %v577_v58 = vsub.f32 %v1061_v18, %v561_v53  ;;  %v505_v19 = vpop.f32.mrb[23].mxu1  ;;  %v1652_v53 = vmul.f32 %v1598_v11, %v1598_v11 }
 0x21a   :  { %v606_v59 = vadd.f32 1e-05, %v590_v17  ;;  %v576_v21 = vsub.f32 %v505_v19, %v560_v15 }
 0x21b   :  { %1133 = vrsqrt.f32 %v607_v57  ;;  %v593_v60 = vmax.f32 %v577_v58, 0.0  ;;  %v1656_v57 = vmul.f32 %v1600_v12, %v1600_v12 }
 0x21c   :  { %1135 = vrsqrt.f32 %v606_v59  ;;  %v592_v27 = vmax.f32 %v576_v21, 0.0  ;;  %v1064_v28 = vpop.f32.mrb[24].mxu1 }
 0x21d   :  { %v1126_v31 = vpop.eup %1125  ;;  %v609_v37 = vadd.f32 1e-05, %v593_v60  ;;  %v579_v39 = vsub.f32 %v1064_v28, %v563_v46  ;;  %v515_v33 = vpop.f32.mrb[25].mxu1 }
 0x21e   :  { %v1128_v41 = vpop.eup %1127  ;;  %v639_v43 = vmul.f32 %v1126_v31, %v1468_v29  ;;  %v608_v44 = vadd.f32 1e-05, %v592_v27  ;;  %v578_v45 = vsub.f32 %v515_v33, %v562_v26 }
 0x21f   :  { %v638_v50 = vmul.f32 %v1128_v41, %v1468_v29  ;;  %1137 = vrsqrt.f32 %v609_v37  ;;  %v595_v51 = vmax.f32 %v579_v39, 0.0 }
 0x220   :  { %v671_v55 = vmul.f32 %v655_v49, %v639_v43  ;;  %1139 = vrsqrt.f32 %v608_v44  ;;  %v594_v15 = vmax.f32 %v578_v45, 0.0  ;;  %v1067_v17 = vpop.f32.mrb[26].mxu1 }
 0x221   :  { %v1130_v18 = vpop.eup %1129  ;;  %v670_v58 = vmul.f32 %v654_v52, %v638_v50  ;;  %v611_v19 = vadd.f32 1e-05, %v595_v51  ;;  %v581_v59 = vsub.f32 %v1067_v17, %v565_v34  ;;  %v525_v21 = vpop.f32.mrb[27].mxu1 }
 0x222   :  { %v1132_v46 = vpop.eup %1131  ;;  %v1659_v60 = vadd.f32 %v1470_v30, %v671_v55  ;;  %v641_v26 = vmul.f32 %v1130_v18, %v1468_v29  ;;  %v610_v27 = vadd.f32 1e-05, %v594_v15  ;;  %v580_v49 = vsub.f32 %v525_v21, %v564_v36 }
 0x223   :  { %v1663_v28 = vadd.f32 %v1470_v30, %v670_v58  ;;  %v640_v31 = vmul.f32 %v1132_v46, %v1468_v29  ;;  %1141 = vrsqrt.f32 %v611_v19  ;;  %v597_v37 = vmax.f32 %v581_v59, 0.0 }
 0x224   :  { %v867_v52 = vmul.f32 -1.442695, %v1659_v60  ;;  %v673_v39 = vmul.f32 %v657_v13, %v641_v26  ;;  %1143 = vrsqrt.f32 %v610_v27  ;;  %v596_v34 = vmax.f32 %v580_v49, 0.0  ;;  %v1070_v33 = vpop.f32.mrb[28].mxu1 }
 0x225   :  { %v1134_v41 = vpop.eup %1133  ;;  %v866_v43 = vmul.f32 -1.442695, %v1663_v28  ;;  %v672_v44 = vmul.f32 %v656_v40, %v640_v31  ;;  %v613_v45 = vadd.f32 1e-05, %v597_v37  ;;  %v583_v50 = vsub.f32 %v1070_v33, %v567_v42  ;;  %v535_v36 = vpop.f32.mrb[29].mxu1 }
 0x226   :  { %v1136_v51 = vpop.eup %1135  ;;  %1145 = vpow2.f32 %v867_v52  ;;  %v1669_v55 = vadd.f32 %v1470_v30, %v673_v39  ;;  %v643_v15 = vmul.f32 %v1134_v41, %v1468_v29  ;;  %v612_v17 = vadd.f32 1e-05, %v596_v34 }
 0x227   :  { %1147 = vpow2.f32 %v866_v43  ;;  %v1673_v13 = vadd.f32 %v1470_v30, %v672_v44  ;;  %v642_v18 = vmul.f32 %v1136_v51, %v1468_v29  ;;  %v599_v58 = vmax.f32 %v583_v50, 0.0 }
 0x228   :  { %v869_v40 = vmul.f32 -1.442695, %v1669_v55  ;;  %v675_v42 = vmul.f32 %v659_v38, %v643_v15  ;;  %1149 = vrsqrt.f32 %v613_v45  ;;  %v582_v19 = vsub.f32 %v535_v36, %v566_v47  ;;  %v1073_v59 = vpop.f32.mrb[30].mxu1 }
 0x229   :  { %v1138_v21 = vpop.eup %1137  ;;  %v868_v46 = vmul.f32 -1.442695, %v1673_v13  ;;  %v674_v26 = vmul.f32 %v658_v20, %v642_v18  ;;  %1151 = vrsqrt.f32 %v612_v17  ;;  %v615_v27 = vadd.f32 1e-05, %v599_v58  ;;  %v545_v49 = vpop.f32.mrb[31].mxu1 }
 0x22a   :  { %v1140_v31 = vpop.eup %1139  ;;  %1153 = vpow2.f32 %v869_v40  ;;  %v1685_v37 = vadd.f32 %v1470_v30, %v675_v42  ;;  %v645_v56 = vmul.f32 %v1138_v21, %v1468_v29  ;;  %v598_v61 = vmax.f32 %v582_v19, 0.0 }
 0x22b   :  { %1155 = vpow2.f32 %v868_v46  ;;  %v1689_v38 = vadd.f32 %v1470_v30, %v674_v26  ;;  %v644_v47 = vmul.f32 %v1140_v31, %v1468_v29  ;;  %v585_v54 = vsub.f32 %v1073_v59, %v1652_v53 }
 0x22c   :  { %v871_v63 = vmul.f32 -1.442695, %v1685_v37  ;;  %v677_v20 = vmul.f32 %v661_v48, %v645_v56  ;;  %1157 = vrsqrt.f32 %v615_v27  ;;  %v614_v52 = vadd.f32 1e-05, %v598_v61 }
 0x22d   :  { %v1142_v39 = vpop.eup %1141  ;;  %v870_v34 = vmul.f32 -1.442695, %v1689_v38  ;;  %v676_v33 = vmul.f32 %v660_v23, %v644_v47  ;;  %v601_v41 = vmax.f32 %v585_v54, 0.0  ;;  %v584_v43 = vsub.f32 %v545_v49, %v1656_v57 }
 0x22e   :  { %v1144_v44 = vpop.eup %1143  ;;  %v662_v53 = vsub.f32 %v1507_v6, %v1588_v4  ;;  %1159 = vpow2.f32 %v871_v63  ;;  %v1705_v0 = vadd.f32 %v1470_v30, %v677_v20  ;;  %v647_v1 = vmul.f32 %v1142_v39, %v1468_v29 }
 0x22f   :  { %1161 = vpow2.f32 %v870_v34  ;;  %v1709_v48 = vadd.f32 %v1470_v30, %v676_v33  ;;  %v646_v62 = vmul.f32 %v1144_v44, %v1468_v29  ;;  %v617_v2 = vadd.f32 1e-05, %v601_v41 }
 0x230   :  { %v1146_v23 = vpop.eup %1145  ;;  %v873_v57 = vmul.f32 -1.442695, %v1705_v0  ;;  %v679_v6 = vmul.f32 %v663_v25, %v647_v1  ;;  %1163 = vrsqrt.f32 %v614_v52  ;;  %v600_v18 = vmax.f32 %v584_v43, 0.0 }
 0x231   :  { %v1148_v4 = vpop.eup %1147  ;;  %v755_v45 = vadd.f32 1.0, %v1146_v23  ;;  %v872_v50 = vmul.f32 -1.442695, %v1709_v48  ;;  %v678_v36 = vmul.f32 %v662_v53, %v646_v62  ;;  %1165 = vrsqrt.f32 %v617_v2 }
 0x232   :  { %v1150_v51 = vpop.eup %1149  ;;  %v754_v15 = vadd.f32 1.0, %v1148_v4  ;;  %1167 = vpow2.f32 %v873_v57  ;;  %v1718_v17 = vadd.f32 %v1470_v30, %v679_v6  ;;  %v665_v40 = vsub.f32 %v1518_v16, %v1590_v5 }
 0x233   :  { %v1152_v58 = vpop.eup %1151  ;;  %1169 = vrcp.f32 %v755_v45  ;;  %v1723_v8 = vadd.f32 %v1470_v30, %v678_v36  ;;  %v649_v3 = vmul.f32 %v1150_v51, %v1468_v29  ;;  %v664_v42 = vsub.f32 %v1515_v14, %v1592_v7 }
 0x234   :  { %v1154_v25 = vpop.eup %1153  ;;  %1171 = vrcp.f32 %v754_v15  ;;  %v875_v19 = vmul.f32 -1.442695, %v1718_v17  ;;  %v648_v59 = vmul.f32 %v1152_v58, %v1468_v29  ;;  %v616_v31 = vadd.f32 1e-05, %v600_v18 }
 0x235   :  { %v1156_v21 = vpop.eup %1155  ;;  %v757_v46 = vadd.f32 1.0, %v1154_v25  ;;  %1173 = vpow2.f32 %v872_v50  ;;  %v874_v16 = vmul.f32 -1.442695, %v1723_v8  ;;  %v681_v5 = vmul.f32 %v665_v40, %v649_v3 }
 0x236   :  { %v1158_v26 = vpop.eup %1157  ;;  %v756_v27 = vadd.f32 1.0, %v1156_v21  ;;  %1175 = vpow2.f32 %v875_v19  ;;  %v680_v49 = vmul.f32 %v664_v42, %v648_v59  ;;  %v667_v56 = vsub.f32 %v1526_v24, %v1594_v9 }
 0x237   :  { %1177 = vrcp.f32 %v757_v46  ;;  %v1734_v14 = vadd.f32 %v1470_v30, %v681_v5  ;;  %v651_v7 = vmul.f32 %v1158_v26, %v1468_v29  ;;  %v666_v33 = vsub.f32 %v1523_v22, %v1596_v10 }
 0x238   :  { %v1160_v61 = vpop.eup %1159  ;;  %1179 = vrcp.f32 %v756_v27  ;;  %v1738_v47 = vadd.f32 %v1470_v30, %v680_v49  ;;  %v669_v53 = vsub.f32 %v1534_v35, %v1598_v11  ;;  %v668_v59 = vsub.f32 %v1531_v32, %v1600_v12 }
 0x239   :  { %v1162_v54 = vpop.eup %1161  ;;  %v759_v63 = vadd.f32 1.0, %v1160_v61  ;;  %1181 = vpow2.f32 %v874_v16  ;;  %v877_v20 = vmul.f32 -1.442695, %v1734_v14  ;;  %v683_v52 = vmul.f32 %v667_v56, %v651_v7 }
 0x23a   :  { %v1164_v39 = vpop.eup %1163  ;;  %v758_v34 = vadd.f32 1.0, %v1162_v54  ;;  %v876_v24 = vmul.f32 -1.442695, %v1738_v47  ;;  %1183 = vrsqrt.f32 %v616_v31 }
 0x23b   :  { %v1166_v9 = vpop.eup %1165  ;;  %1185 = vrcp.f32 %v759_v63  ;;  %v1745_v41 = vadd.f32 %v1470_v30, %v683_v52  ;;  %v650_v43 = vmul.f32 %v1164_v39, %v1468_v29 }
 0x23c   :  { %v1168_v44 = vpop.eup %1167  ;;  %1187 = vrcp.f32 %v758_v34  ;;  %v653_v1 = vmul.f32 %v1166_v9, %v1468_v29 }
 0x23d   :  { %v1170_v62 = vpop.eup %1169  ;;  %v761_v2 = vadd.f32 1.0, %v1168_v44  ;;  %1189 = vpow2.f32 %v877_v20  ;;  %v879_v23 = vmul.f32 -1.442695, %v1745_v41  ;;  %v682_v57 = vmul.f32 %v666_v33, %v650_v43 }
 0x23e   :  { %v1172_v22 = vpop.eup %1171  ;;  %v803_v10 = vmul.f32 %v1170_v62, %v1659_v60  ;;  %1191 = vpow2.f32 %v876_v24  ;;  %v685_v6 = vmul.f32 %v669_v53, %v653_v1 }
 0x23f   :  { %v1174_v4 = vpop.eup %1173  ;;  %v802_v45 = vmul.f32 %v1172_v22, %v1663_v28  ;;  %1193 = vrcp.f32 %v761_v2  ;;  %v1755_v35 = vadd.f32 %v1470_v30, %v682_v57 }
 0x240   :  { %v1176_v11 = vpop.eup %1175  ;;  %819 = vst [vmem:[#allocation2 + $0x8] sm:$0xff] %v803_v10  ;;  %v760_v50 = vadd.f32 1.0, %v1174_v4  ;;  %1195 = vpow2.f32 %v879_v23  ;;  %v1758_v36 = vadd.f32 %v1470_v30, %v685_v6 }
 0x241   :  { %v1178_v51 = vpop.eup %1177  ;;  %818 = vst [vmem:[#allocation2] sm:$0xff] %v802_v45  ;;  %v763_v15 = vadd.f32 1.0, %v1176_v11  ;;  %v878_v60 = vmul.f32 -1.442695, %v1755_v35 }
 0x242   :  { %v1180_v18 = vpop.eup %1179  ;;  %v805_v58 = vmul.f32 %v1178_v51, %v1669_v55  ;;  %1197 = vrcp.f32 %v760_v50  ;;  %v881_v28 = vmul.f32 -1.442695, %v1758_v36 }
 0x243   :  { %v1182_v40 = vpop.eup %1181  ;;  %v804_v3 = vmul.f32 %v1180_v18, %v1673_v13  ;;  %1199 = vrcp.f32 %v763_v15 }
 0x244   :  { %v1184_v25 = vpop.eup %1183  ;;  %821 = vst [vmem:[#allocation2 + $0x18] sm:$0xff] %v805_v58  ;;  %v762_v42 = vadd.f32 1.0, %v1182_v40  ;;  %1201 = vpow2.f32 %v878_v60 }
 0x245   :  { %v1186_v19 = vpop.eup %1185  ;;  %820 = vst [vmem:[#allocation2 + $0x10] sm:$0xff] %v804_v3  ;;  %1203 = vpow2.f32 %v881_v28  ;;  %v652_v21 = vmul.f32 %v1184_v25, %v1468_v29 }
 0x246   :  { %v1188_v55 = vpop.eup %1187  ;;  %v807_v46 = vmul.f32 %v1186_v19, %v1685_v37  ;;  %1205 = vrcp.f32 %v762_v42 }
 0x247   :  { %v1190_v16 = vpop.eup %1189  ;;  %v806_v13 = vmul.f32 %v1188_v55, %v1689_v38  ;;  %v684_v5 = vmul.f32 %v668_v59, %v652_v21 }
 0x248   :  { %v1192_v26 = vpop.eup %1191  ;;  %823 = vst [vmem:[#allocation2 + $0x28] sm:$0xff] %v807_v46  ;;  %v765_v27 = vadd.f32 1.0, %v1190_v16 }
 0x249   :  { %v1194_v49 = vpop.eup %1193  ;;  %822 = vst [vmem:[#allocation2 + $0x20] sm:$0xff] %v806_v13  ;;  %v764_v31 = vadd.f32 1.0, %v1192_v26  ;;  %v704_v32 = vadd.f32 %v1470_v30, %v684_v5 }
 0x24a   :  { %v1196_v12 = vpop.eup %1195  ;;  %v809_v56 = vmul.f32 %v1194_v49, %v1705_v0  ;;  %1207 = vrcp.f32 %v765_v27 }
 0x24b   :  { %1209 = vrcp.f32 %v764_v31  ;;  %v767_v29 = vadd.f32 1.0, %v1196_v12  ;;  %v880_v37 = vmul.f32 -1.442695, %v704_v32 }
 0x24c   :  { %v1198_v7 = vpop.eup %1197  ;;  %825 = vst [vmem:[#allocation2 + $0x38] sm:$0xff] %v809_v56 }
 0x24d   :  { %v1200_v61 = vpop.eup %1199  ;;  %v808_v38 = vmul.f32 %v1198_v7, %v1709_v48  ;;  %1211 = vrcp.f32 %v767_v29 }
 0x24e   :  { %v1202_v54 = vpop.eup %1201  ;;  %v811_v63 = vmul.f32 %v1200_v61, %v1718_v17  ;;  %1213 = vpow2.f32 %v880_v37 }
 0x24f   :  { %v1204_v20 = vpop.eup %1203  ;;  %824 = vst [vmem:[#allocation2 + $0x30] sm:$0xff] %v808_v38  ;;  %v766_v30 = vadd.f32 1.0, %v1202_v54 }
 0x250   :  { %v1206_v52 = vpop.eup %1205  ;;  %827 = vst [vmem:[#allocation2 + $0x48] sm:$0xff] %v811_v63  ;;  %v769_v0 = vadd.f32 1.0, %v1204_v20 }
 0x251   :  { %v810_v39 = vmul.f32 %v1206_v52, %v1723_v8  ;;  %1215 = vrcp.f32 %v766_v30 }
 0x252   :  { %1217 = vrcp.f32 %v769_v0 }
 0x253   :  { %826 = vst [vmem:[#allocation2 + $0x40] sm:$0xff] %v810_v39 }
 0x254   :  { %v1208_v34 = vpop.eup %1207 }
 0x255   :  { %v1210_v24 = vpop.eup %1209  ;;  %v813_v48 = vmul.f32 %v1208_v34, %v1734_v14 }
 0x256   :  { %v812_v9 = vmul.f32 %v1210_v24, %v1738_v47 }
 0x257   :  { %v1212_v33 = vpop.eup %1211  ;;  %829 = vst [vmem:[#allocation2 + $0x58] sm:$0xff] %v813_v48 }
 0x258   :  { %v1214_v17 = vpop.eup %1213  ;;  %828 = vst [vmem:[#allocation2 + $0x50] sm:$0xff] %v812_v9  ;;  %v815_v43 = vmul.f32 %v1212_v33, %v1745_v41 }
 0x259   :  { %v768_v44 = vadd.f32 1.0, %v1214_v17 }
 0x25a   :  { %831 = vst [vmem:[#allocation2 + $0x68] sm:$0xff] %v815_v43 }
 0x25b   :  { %v1216_v53 = vpop.eup %1215  ;;  %1219 = vrcp.f32 %v768_v44 }
 0x25c   :  { %v1218_v8 = vpop.eup %1217  ;;  %v814_v1 = vmul.f32 %v1216_v53, %v1755_v35 }
 0x25d   :  { %v817_v62 = vmul.f32 %v1218_v8, %v1758_v36 }
 0x25e   :  { %830 = vst [vmem:[#allocation2 + $0x60] sm:$0xff] %v814_v1 }
 0x25f   :  { %833 = vst [vmem:[#allocation2 + $0x78] sm:$0xff] %v817_v62 }
 0x265   :  { %v1220_v14 = vpop.eup %1219 }
 0x266   :  { %v816_v47 = vmul.f32 %v1220_v14, %v704_v32 }
 0x268   :  { %832 = vst [vmem:[#allocation2 + $0x70] sm:$0xff] %v816_v47 }
 0x269   :  { %1232 = shalt.err (!%p1229_p4)
}
 0x26a   :  { %s1233_s13 = scalar_lea.hbm %s1795_s4, 2048 }
 0x26b   :  { %p1234_p5 = scmp.ne.s32.totalorder %s1795_s4, %s1233_s13  ;;  %p1237_p6 = scmp.lt.u32.totalorder %s1233_s13, %s1795_s4 }
 0x26d   :  { %p1239_p7 = pnand %p1237_p6, %p1234_p5 }
 0x26f   :  { %1242 = shalt.err (!%p1239_p7)
}
 0x270   :  { %s1246_s18 = smov 128   ;;  %s1247_s19 = smov 8  }
 0x271   :  { %845 = dma.vmem_to_hbm [thread:$0]  %s840_s3, 2048, %s1795_s4, [#allocation3], %s1246_s18, %s1246_s18, %s1247_s19  }
 0x272   :  { %1243 = dma.done.wait [#allocation3], 2048  }
 0x273   :  { %1244 = vsyncadd [#allocation3], 4294965248 }
 0x274   :  { %849 = vsyncpa [#allocation3], 1 }

</bundles_post_ra>
